<compile_context>
chip_gen: v7x
topology: tpu7x:2x2x1
jax: 0.10.0
libtpu: 0.0.40
codegen_flags: <defaults>
</compile_context>

<pallas_src>
import jax
import jax.numpy as jnp
from jax.experimental import pallas as pl
from jax.experimental.pallas import tpu as pltpu

OUT_CH = 512  # hard-coded in the PyTorch module (nn.Conv2d(in_dim, 512, 1))
_VMEM_LIMIT = 40 * 1024 * 1024  # safe on v5e/v6e (128 MiB) and v7x (64 MiB/TC)


def _pick_hw_tile(hw, c, oc, in_itemsize, out_itemsize, budget_bytes=24 << 20):
    """Largest lane-dense HW tile (multiple of 128, <= 2048) whose double-buffered
    pass-1/pass-2 working set fits a conservative VMEM budget (v7x-safe)."""
    hw128 = -(-hw // 128) * 128
    for t in (2048, 1024, 512, 256, 128):
        if t > hw128:
            continue
        need = (2 * c * t * in_itemsize        # x tile (double-buffered)
                + 2 * oc * t * in_itemsize     # x1 tile (pass 2)
                + 2 * oc * t * out_itemsize    # out tile (pass 2)
                + 4 * oc * c * 4               # W + W_eff (f32, double-buffered)
                + c * c * 4                    # energy scratch (pass 1)
                + oc * 4)                      # bias
        if need <= budget_bytes:
            return t
    return 128


def _weff_kernel(x_ref, w_ref, g_ref, weff_ref, energy_acc):
    # x_ref : (C, hw_tile)   one spatial tile of this batch element
    # w_ref : (OC, C)        1x1 conv weight
    # g_ref : (1,)  SMEM     gamma scalar
    # weff_ref : (OC, C)     per-batch effective weight (output)
    # energy_acc : (C, C) f32 scratch, accumulated across HW tiles
    h = pl.program_id(1)

    @pl.when(h == 0)
    def _():
        energy_acc[...] = jnp.zeros_like(energy_acc)

    xt = x_ref[...]
    # energy += x_tile @ x_tile^T  (contract over the spatial/lane axis)
    energy_acc[...] += jax.lax.dot_general(
        xt, xt, (((1,), (1,)), ((), ())), preferred_element_type=jnp.float32)

    @pl.when(h == pl.num_programs(1) - 1)
    def _():
        energy = energy_acc[...]
        # softmax(rowmax(E) - E) == exp(rowmin(E) - E) / rowsum(exp(rowmin(E) - E))
        # (single cross-lane reduction instead of two).
        e = jnp.exp(jnp.min(energy, axis=-1, keepdims=True) - energy)
        inv = pl.reciprocal(jnp.sum(e, axis=-1, keepdims=True), approx=True)
        attention = e * inv

        # W_eff = W @ (gamma*A + I) == gamma * (W @ A) + W   (no eye/iota build needed)
        w = w_ref[...].astype(jnp.float32)
        g = g_ref[0]
        weff = g * jnp.dot(w, attention, preferred_element_type=jnp.float32) + w
        weff_ref[...] = weff.astype(weff_ref.dtype)


def _apply_kernel(weff_ref, x_ref, x1_ref, b_ref, out_ref):
    # weff_ref: (OC, C), x_ref: (C, hw_tile), x1_ref: (OC, hw_tile), b_ref: (OC, 1)
    # TODO(synk): for C >= 512 f32 inputs, cast weff/x tiles to bf16 here (f32 accum)
    # to hit the bf16 MXU path on v6e/v7x; irrelevant at the small mem-bound test sizes.
    pam = jnp.dot(weff_ref[...], x_ref[...], preferred_element_type=jnp.float32)
    out_ref[...] = (pam + b_ref[...] + x1_ref[...]).astype(out_ref.dtype)


def cam_module_forward(x, x1, weight, bias, gamma):
    """CAM_Module.forward(x, x1, flag=False, MS=True) -> (f_out, x1)."""
    B, C, H, W = x.shape
    OC = weight.shape[0]
    HW = H * W

    itemsize = jnp.dtype(x.dtype).itemsize
    hw_tile = _pick_hw_tile(HW, C, OC, itemsize, itemsize)
    HW_pad = -(-HW // hw_tile) * hw_tile
    n_hw = HW_pad // hw_tile

    x_f = x.reshape(B, C, HW)
    x1_f = x1.reshape(B, OC, HW)
    if HW_pad != HW:
        # Zero padding is exact: zero columns contribute nothing to energy = x @ x^T,
        # and the padded output region is sliced off below.
        x_f = jnp.pad(x_f, ((0, 0), (0, 0), (0, HW_pad - HW)))
        x1_f = jnp.pad(x1_f, ((0, 0), (0, 0), (0, HW_pad - HW)))

    w2 = weight.reshape(OC, C).astype(jnp.float32)
    b2 = bias.reshape(OC, 1).astype(jnp.float32)
    g1 = gamma.reshape(1).astype(jnp.float32)

    # ---------------- Pass 1: per-batch effective weight W_eff = gamma*(W @ A) + W
    # TODO(synk): on v7x (2 TCs) with B == 1, split the HW reduction over a leading
    # parallel axis (partial energies + tiny combine) so both cores are busy.
    weff = pl.pallas_call(
        _weff_kernel,
        out_shape=jax.ShapeDtypeStruct((B, OC, C), jnp.float32),
        grid=(B, n_hw),
        in_specs=[
            pl.BlockSpec((None, C, hw_tile), lambda b, h: (b, 0, h)),
            pl.BlockSpec((OC, C), lambda b, h: (0, 0)),
            pl.BlockSpec(memory_space=pltpu.MemorySpace.SMEM),
        ],
        out_specs=pl.BlockSpec((None, OC, C), lambda b, h: (b, 0, 0)),
        scratch_shapes=[pltpu.VMEM((C, C), jnp.float32)],
        compiler_params=pltpu.CompilerParams(
            dimension_semantics=("parallel", "arbitrary"),
            vmem_limit_bytes=_VMEM_LIMIT),
        cost_estimate=pl.CostEstimate(
            flops=2 * B * C * C * HW_pad + 2 * B * OC * C * C,
            transcendentals=B * C * C,
            bytes_accessed=B * C * HW_pad * itemsize + (OC * C + B * OC * C) * 4),
    )(x_f, w2, g1)

    # ---------------- Pass 2: f_out = W_eff @ x + bias + x1  (tiled over HW, mem-bound)
    f_out = pl.pallas_call(
        _apply_kernel,
        out_shape=jax.ShapeDtypeStruct((B, OC, HW_pad), x.dtype),
        grid=(B, n_hw),
        in_specs=[
            pl.BlockSpec((None, OC, C), lambda b, h: (b, 0, 0)),
            pl.BlockSpec((None, C, hw_tile), lambda b, h: (b, 0, h)),
            pl.BlockSpec((None, OC, hw_tile), lambda b, h: (b, 0, h)),
            pl.BlockSpec((OC, 1), lambda b, h: (0, 0)),
        ],
        out_specs=pl.BlockSpec((None, OC, hw_tile), lambda b, h: (b, 0, h)),
        compiler_params=pltpu.CompilerParams(
            dimension_semantics=("parallel", "parallel"),
            vmem_limit_bytes=_VMEM_LIMIT),
        cost_estimate=pl.CostEstimate(
            flops=2 * B * OC * C * HW_pad,
            transcendentals=0,
            bytes_accessed=(B * OC * C + OC) * 4
            + (B * C * HW_pad + 2 * B * OC * HW_pad) * itemsize),
    )(weff, x_f, x1_f, b2)

    f_out = f_out[:, :, :HW].reshape(B, OC, H, W)
    # flag == False -> x1 is returned unchanged.
    return f_out, x1


def cam_reference(x, x1, weight, bias, gamma):
    """Pure-JAX reference mirroring the PyTorch forward (flag=False, MS=True)."""
    B, C, H, W = x.shape
    OC = weight.shape[0]
    pq = x.reshape(B, C, H * W)
    energy = jnp.einsum('bcn,bdn->bcd', pq, pq)
    energy_new = jnp.max(energy, axis=-1, keepdims=True) - energy
    attention = jax.nn.softmax(energy_new, axis=-1)
    out = jnp.einsum('bcd,bdn->bcn', attention, pq).reshape(B, C, H, W)
    out = gamma * out + x
    pam = jnp.einsum('oc,bchw->bohw', weight.reshape(OC, C), out) \
        + bias[None, :, None, None]
    return pam + x1, x1


if __name__ == "__main__":
    key = jax.random.PRNGKey(0)
    k1, k2, k3, k4 = jax.random.split(key, 4)

    B, C, H, W = 2, 8, 16, 16
    OC = OUT_CH

    x = jax.random.normal(k1, (B, C, H, W), jnp.float32)
    x1 = jax.random.normal(k2, (B, OC, H, W), jnp.float32)
    # Deterministic synthetic parameters (shapes from nn.Conv2d(in_dim, 512, 1)).
    weight = 0.05 * jax.random.normal(k3, (OC, C, 1, 1), jnp.float32)
    bias = 0.01 * jax.random.normal(k4, (OC,), jnp.float32)
    gamma_init = jnp.zeros((1,), jnp.float32)   # nn.Parameter(torch.zeros(1))

    # Module-style gamma=0 forward.
    f_out, x1_out = cam_module_forward(x, x1, weight, bias, gamma_init)
    jax.block_until_ready(f_out)
    ref_out, _ = cam_reference(x, x1, weight, bias, gamma_init)
    assert jnp.allclose(f_out, ref_out, atol=1e-4, rtol=1e-4)

    # Non-zero gamma so the attention path (and the W_eff fusion) is exercised.
    gamma_nz = jnp.full((1,), 0.5, jnp.float32)
    f_out2, _ = cam_module_forward(x, x1, weight, bias, gamma_nz)
    jax.block_until_ready(f_out2)
    ref_out2, _ = cam_reference(x, x1, weight, bias, gamma_nz)
    assert jnp.allclose(f_out2, ref_out2, atol=1e-3, rtol=1e-3)

    # TODO(synk): layer=3 / layer=2 strided-3x3 conv_downsampling variants and the
    # flag=True branch are not implemented; only the layer=4 (1x1 conv) path is.
    print("KERNEL_OK")
</pallas_src>

<mosaic_0001>
module attributes {stable_mosaic.version = 11 : i64} {
  func.func @_weff_kernel(%arg0: i32, %arg1: i32, %arg2: memref<1x8x256xf32, #tpu.memory_space<vmem>>, %arg3: memref<512x8xf32, #tpu.memory_space<vmem>>, %arg4: memref<1xf32, #tpu.memory_space<smem>>, %arg5: memref<1x512x8xf32, #tpu.memory_space<vmem>>, %arg6: memref<8x8xf32, #tpu.memory_space<vmem>>) attributes {dimension_semantics = [#tpu.dimension_semantics<parallel>, #tpu.dimension_semantics<arbitrary>], iteration_bounds = array<i64: 2, 1>, scalar_prefetch = 0 : i64, scratch_operands = 1 : i64, tpu.core_type = #tpu.core_type<tc>, window_params = [{transform_indices = @transform_0, window_bounds = array<i64: 1, 8, 256>}, {pipeline_mode = #tpu.pipeline_mode<synchronous>, transform_indices = @transform_1, window_bounds = array<i64: 512, 8>}, {transform_indices = @transform_2, window_bounds = array<i64: 1>}, {transform_indices = @transform_3, window_bounds = array<i64: 1, 512, 8>}]} {
    %c0_i32 = arith.constant 0 : i32
    %0 = arith.cmpi eq, %arg1, %c0_i32 : i32
    %1 = arith.extui %0 : i1 to i32
    %c0_i32_0 = arith.constant 0 : i32
    %2 = arith.cmpi ne, %1, %c0_i32_0 : i32
    scf.if %2 {
      %cst_9 = arith.constant 0.000000e+00 : f32
      %12 = vector.broadcast %cst_9 : f32 to vector<8x8xf32>
      %c0_10 = arith.constant 0 : index
      %c0_11 = arith.constant 0 : index
      %13 = vector.load %arg6[%c0_10, %c0_11] : memref<8x8xf32, #tpu.memory_space<vmem>>, vector<8x8xf32>
      tpu.vector_store %arg6[%c0_10, %c0_11], %12 {strides = array<i32>} : memref<8x8xf32, #tpu.memory_space<vmem>>, vector<8x8xf32>,
    } else {
    }
    %c0 = arith.constant 0 : index
    %c0_1 = arith.constant 0 : index
    %c0_2 = arith.constant 0 : index
    %3 = vector.load %arg2[%c0, %c0_1, %c0_2] : memref<1x8x256xf32, #tpu.memory_space<vmem>>, vector<1x8x256xf32>
    %4 = vector.shape_cast %3 : vector<1x8x256xf32> to vector<8x256xf32>
    %c0_3 = arith.constant 0 : index
    %c0_4 = arith.constant 0 : index
    %5 = vector.load %arg6[%c0_3, %c0_4] : memref<8x8xf32, #tpu.memory_space<vmem>>, vector<8x8xf32>
    %cst = arith.constant dense<0.000000e+00> : vector<8x8xf32>
    %6 = tpu.matmul %4, %4, %cst {dimension_numbers = #tpu.dot_dimension_numbers<[1], [1], [0], [0], [0, 0, 1, 0], [], []>} : vector<8x256xf32>, vector<8x256xf32>, vector<8x8xf32> -> vector<8x8xf32>
    %7 = arith.addf %5, %6 : vector<8x8xf32>
    %c0_5 = arith.constant 0 : index
    %c0_6 = arith.constant 0 : index
    %8 = vector.load %arg6[%c0_5, %c0_6] : memref<8x8xf32, #tpu.memory_space<vmem>>, vector<8x8xf32>
    tpu.vector_store %arg6[%c0_5, %c0_6], %7 {strides = array<i32>} : memref<8x8xf32, #tpu.memory_space<vmem>>, vector<8x8xf32>,
    %c0_i32_7 = arith.constant 0 : i32
    %9 = arith.cmpi eq, %arg1, %c0_i32_7 : i32
    %10 = arith.extui %9 : i1 to i32
    %c0_i32_8 = arith.constant 0 : i32
    %11 = arith.cmpi ne, %10, %c0_i32_8 : i32
    scf.if %11 {
      %c0_9 = arith.constant 0 : index
      %c0_10 = arith.constant 0 : index
      %12 = vector.load %arg6[%c0_9, %c0_10] : memref<8x8xf32, #tpu.memory_space<vmem>>, vector<8x8xf32>
      %cst_11 = arith.constant dense<0x7F800000> : vector<8xf32>
      %13 = vector.multi_reduction <minimumf>, %12, %cst_11 [1] : vector<8x8xf32> to vector<8xf32>
      %14 = vector.shape_cast %13 : vector<8xf32> to vector<8x1xf32>
      %15 = vector.broadcast %14 : vector<8x1xf32> to vector<8x8xf32>
      %16 = arith.subf %15, %12 : vector<8x8xf32>
      %17 = math.exp %16 : vector<8x8xf32>
      %cst_12 = arith.constant dense<0.000000e+00> : vector<8xf32>
      %18 = vector.multi_reduction <add>, %17, %cst_12 [1] : vector<8x8xf32> to vector<8xf32>
      %19 = vector.shape_cast %18 : vector<8xf32> to vector<8x1xf32>
      %20 = tpu.reciprocal %19 {approx = true} : vector<8x1xf32> -> vector<8x1xf32>
      %21 = vector.broadcast %20 : vector<8x1xf32> to vector<8x8xf32>
      %22 = arith.mulf %17, %21 : vector<8x8xf32>
      %c0_13 = arith.constant 0 : index
      %c0_14 = arith.constant 0 : index
      %23 = vector.load %arg3[%c0_13, %c0_14] : memref<512x8xf32, #tpu.memory_space<vmem>>, vector<512x8xf32>
      %c0_15 = arith.constant 0 : index
      %24 = memref.load %arg4[%c0_15] : memref<1xf32, #tpu.memory_space<smem>>
      %cst_16 = arith.constant dense<0.000000e+00> : vector<512x8xf32>
      %25 = tpu.matmul %23, %22, %cst_16 {dimension_numbers = #tpu.dot_dimension_numbers<[1], [0], [0], [1], [0, 0, 1, 1], [], []>} : vector<512x8xf32>, vector<8x8xf32>, vector<512x8xf32> -> vector<512x8xf32>
      %26 = vector.broadcast %24 : f32 to vector<512x8xf32>
      %27 = arith.mulf %26, %25 : vector<512x8xf32>
      %28 = arith.addf %27, %23 : vector<512x8xf32>
      %c0_17 = arith.constant 0 : index
      %c0_18 = arith.constant 0 : index
      %c0_19 = arith.constant 0 : index
      %29 = vector.load %arg5[%c0_17, %c0_18, %c0_19] : memref<1x512x8xf32, #tpu.memory_space<vmem>>, vector<1x512x8xf32>
      %30 = vector.shape_cast %29 : vector<1x512x8xf32> to vector<512x8xf32>
      %31 = vector.shape_cast %28 : vector<512x8xf32> to vector<1x512x8xf32>
      tpu.vector_store %arg5[%c0_17, %c0_18, %c0_19], %31 {strides = array<i32>} : memref<1x512x8xf32, #tpu.memory_space<vmem>>, vector<1x512x8xf32>,
    } else {
    }
    return
  }
  func.func @transform_0(%arg0: i32, %arg1: i32) -> (i32, i32, i32) {
    %c0_i32 = arith.constant 0 : i32
    %c0_i32_0 = arith.constant 0 : i32
    return %arg0, %c0_i32, %arg1 : i32, i32, i32
  }
  func.func @transform_1(%arg0: i32, %arg1: i32) -> (i32, i32) {
    %c0_i32 = arith.constant 0 : i32
    %c0_i32_0 = arith.constant 0 : i32
    %c0_i32_1 = arith.constant 0 : i32
    return %c0_i32, %c0_i32_0 : i32, i32
  }
  func.func @transform_2(%arg0: i32, %arg1: i32) -> i32 {
    %c0_i32 = arith.constant 0 : i32
    %c0_i32_0 = arith.constant 0 : i32
    return %c0_i32 : i32
  }
  func.func @transform_3(%arg0: i32, %arg1: i32) -> (i32, i32, i32) {
    %c0_i32 = arith.constant 0 : i32
    %c0_i32_0 = arith.constant 0 : i32
    %c0_i32_1 = arith.constant 0 : i32
    return %arg0, %c0_i32, %c0_i32_0 : i32, i32, i32
  }
}

</mosaic_0001>

<bundles_post_ra>
// kernel: tpu_custom_call.1
= control target key start
LH: loop header
LB: loop body
LE: loop exit
PB: predicated region body
PF: predicated region fallthrough
CT: control target
= control target key end

     0   :  { %s1520_s14 = smov 0   ;;  %s1522_s15 = smov 0   ;;  %s2269_s0 = inlined_call_operand.vmem [shape: f32[2,8,256], index: 0, kind: input, shape index: {}]   ;;  %s2270_s1 = inlined_call_operand.vmem [shape: f32[512,8], index: 1, kind: input, shape index: {}]   ;;  %s2271_s2 = inlined_call_operand.<no memory space> [shape: f32[1], index: 2, kind: input, shape index: {}]   ;;  %s2272_s3 = inlined_call_operand.vmem [shape: f32[2,512,8], index: 3, kind: output, shape index: {}]  }
   0x1   :  { %8 = sst [smem:[#allocation3]] %s2271_s2  ;;  %s1524_s16 = smov 0  }
   0x2 LB: > { %s26_s2 = sadd.s32 1, %s1490_s15  ;;  %p1205_p0 = scmp.ge.s32.totalorder %s1494_s16, 1  ;;  %s1494_s16 = sphi %s1524_s16, %s14_s16   ;;  %s1490_s15 = sphi %s1522_s15, %s2319_s15   ;;  %s1486_s14 = sphi %s1520_s14, %s2318_s14  }
   0x3   : > { %p28_p1 = scmp.ge.s32.totalorder %s26_s2, 2  ;;  %p157_p2 = scmp.lt.s32.totalorder %s1494_s16, 3 }
   0x5   : > { %s2321_s2 = smov (%p28_p1, %s26_s2), 0  ;;  %p158_p3 = pnand %p1205_p0, %p157_p2 }
   0x7   : > { %161 = sbr.rel (%p158_p3) target bundleno = 844 (0x34c), region = 32 }
   0xe   : > { %p186_p4 = scmp.lt.s32.totalorder %s1486_s14, 1  ;;  %vm204_vm0 = vcmask 64512   ;;  %v1496_v0 = vmov 0.0   ;;  %v1551_v14 = vld [vmem:[%s2270_s1 + $0xf0] sm:$0xff]  ;;  %v1558_v15 = vld [vmem:[%s2270_s1] sm:$0xff]  ;;  %v1565_v19 = vld [vmem:[%s2270_s1 + $0xf8] sm:$0xff] }
   0xf   : > { %205 = vst.msk [vmem:[#allocation2] sm:$0xff] %vm204_vm0, %v1496_v0  ;;  %1390 = vmatprep.mubr.msk.f32.mxu1 %vm204_vm0, %v1551_v14  ;;  %v1570_v20 = vld [vmem:[%s2270_s1 + $0x8] sm:$0xff]  ;;  %v1575_v21 = vld [vmem:[%s2270_s1 + $0x100] sm:$0xff]  ;;  %v1580_v22 = vld [vmem:[%s2270_s1 + $0x10] sm:$0xff]  ;;  %s361_s29 = sld [smem:[#allocation3]] }
  0x10   : > { %s2323_s14 = smov (!%p186_p4, %s1486_s14), 1  ;;  %v1591_v23 = vld [vmem:[%s2270_s1 + $0x108] sm:$0xff]  ;;  %v1598_v24 = vld [vmem:[%s2270_s1 + $0x18] sm:$0xff]  ;;  %v1603_v25 = vld [vmem:[%s2270_s1 + $0x110] sm:$0xff] }
  0x11   : > { %s1276_s17 = sshll.u32 %s2323_s14, 4  ;;  %v1608_v26 = vld [vmem:[%s2270_s1 + $0x20] sm:$0xff]  ;;  %v1619_v27 = vld [vmem:[%s2270_s1 + $0x118] sm:$0xff]  ;;  %v1626_v28 = vld [vmem:[%s2270_s1 + $0x28] sm:$0xff]  ;;  %s1277_s30 = sshll.u32 %s2323_s14, 9 }
  0x12   : > { %s193_s20 = scalar_lea.vmem %s2269_s0, %s1276_s17  ;;  %v1631_v29 = vld [vmem:[%s2270_s1 + $0x120] sm:$0xff]  ;;  %v1636_v30 = vld [vmem:[%s2270_s1 + $0x30] sm:$0xff]  ;;  %v1647_v31 = vld [vmem:[%s2270_s1 + $0x128] sm:$0xff]  ;;  %s2004_s6 = scalar_lea.vmem %s2272_s3, %s1277_s30 }
  0x13   : > { %v207_v1 = vld [vmem:[%s193_s20 + $0x8] sm:$0xff]  ;;  %v206_v2 = vld [vmem:[%s193_s20] sm:$0xff]  ;;  %v1654_v32 = vld [vmem:[%s2270_s1 + $0x38] sm:$0xff] }
  0x14   : > { %209 = vmatprep.subr.mxu0 %v207_v1  ;;  %273 = vmatprep.mubr.f32.mxu0 %v207_v1  ;;  %v1659_v33 = vld [vmem:[%s2270_s1 + $0x130] sm:$0xff]  ;;  %v1664_v34 = vld [vmem:[%s2270_s1 + $0x40] sm:$0xff]  ;;  %v1675_v35 = vld [vmem:[%s2270_s1 + $0x138] sm:$0xff] }
  0x15   : > { %210 = vmatpush1.xpose.msra.mxu0 %v206_v2  ;;  %v1682_v36 = vld [vmem:[%s2270_s1 + $0x48] sm:$0xff]  ;;  %v1687_v37 = vld [vmem:[%s2270_s1 + $0x140] sm:$0xff]  ;;  %v1692_v38 = vld [vmem:[%s2270_s1 + $0x50] sm:$0xff] }
  0x16   : > { %v208_v3 = vld [vmem:[#allocation2] sm:$0xff]  ;;  %v1703_v39 = vld [vmem:[%s2270_s1 + $0x148] sm:$0xff]  ;;  %v1710_v40 = vld [vmem:[%s2270_s1 + $0x58] sm:$0xff] }
  0x17   : > { %v1715_v41 = vld [vmem:[%s2270_s1 + $0x150] sm:$0xff]  ;;  %v1720_v42 = vld [vmem:[%s2270_s1 + $0x60] sm:$0xff]  ;;  %v1731_v43 = vld [vmem:[%s2270_s1 + $0x158] sm:$0xff] }
  0x18   : > { %274 = vmatmul.mubr.f32.vlgmr.msra.gmra.mrb[0].mxu0 %v206_v2  ;;  %v1738_v44 = vld [vmem:[%s2270_s1 + $0x68] sm:$0xff]  ;;  %v1743_v45 = vld [vmem:[%s2270_s1 + $0x160] sm:$0xff]  ;;  %v1748_v46 = vld [vmem:[%s2270_s1 + $0x70] sm:$0xff] }
  0x19   : > { %1345 = vmatprep.mubr.msk.f32.mxu0 %vm204_vm0, %v1558_v15  ;;  %v1759_v47 = vld [vmem:[%s2270_s1 + $0x168] sm:$0xff]  ;;  %v1766_v48 = vld [vmem:[%s2270_s1 + $0x78] sm:$0xff]  ;;  %v1771_v49 = vld [vmem:[%s2270_s1 + $0x170] sm:$0xff] }
  0x1a   : > { %v1776_v50 = vld [vmem:[%s2270_s1 + $0x80] sm:$0xff]  ;;  %v1787_v51 = vld [vmem:[%s2270_s1 + $0x178] sm:$0xff]  ;;  %v1794_v52 = vld [vmem:[%s2270_s1 + $0x88] sm:$0xff] }
  0x1b   : > { %v1799_v53 = vld [vmem:[%s2270_s1 + $0x180] sm:$0xff]  ;;  %v1804_v54 = vld [vmem:[%s2270_s1 + $0x90] sm:$0xff]  ;;  %v1815_v55 = vld [vmem:[%s2270_s1 + $0x188] sm:$0xff] }
  0x1c   : > { %v1822_v56 = vld [vmem:[%s2270_s1 + $0x98] sm:$0xff]  ;;  %v1827_v57 = vld [vmem:[%s2270_s1 + $0x190] sm:$0xff]  ;;  %v1832_v58 = vld [vmem:[%s2270_s1 + $0xa0] sm:$0xff] }
  0x1d   : > { %v1843_v59 = vld [vmem:[%s2270_s1 + $0x198] sm:$0xff]  ;;  %v1850_v60 = vld [vmem:[%s2270_s1 + $0xa8] sm:$0xff]  ;;  %v1855_v61 = vld [vmem:[%s2270_s1 + $0x1a0] sm:$0xff] }
  0x1e   : > { %v1860_v62 = vld [vmem:[%s2270_s1 + $0xb0] sm:$0xff]  ;;  %v1871_v63 = vld [vmem:[%s2270_s1 + $0x1a8] sm:$0xff]  ;;  %v1878_v0 = vld [vmem:[%s2270_s1 + $0xb8] sm:$0xff] }
  0x1f   : > { %v1883_v1 = vld [vmem:[%s2270_s1 + $0x1b0] sm:$0xff]  ;;  %v1888_v2 = vld [vmem:[%s2270_s1 + $0xc0] sm:$0xff] }
  0x20   : > { %2288 = vst [vmem:[#allocation4_spill] sm:$0xff] %v1883_v1  ;;  %2289 = vst [vmem:[#allocation5_spill] sm:$0xff] %v1888_v2 }
  0xeb   : > { %v275_v4 = vpop.f32.mrb[0].mxu0 }
  0xec   : > { %v279_v5 = vadd.f32 %v275_v4, %v208_v3  ;;  %v277_v6 = vpop.f32.mrb[1].mxu0  ;;  %v1899_v3 = vld [vmem:[%s2270_s1 + $0x1b8] sm:$0xff]  ;;  %v1906_v4 = vld [vmem:[%s2270_s1 + $0xc8] sm:$0xff] }
  0xed   : > { %2290 = vst [vmem:[#allocation6_spill] sm:$0xff] %v1906_v4  ;;  %v1916_v6 = vld [vmem:[%s2270_s1 + $0xd0] sm:$0xff] }
  0xee   : > { %281 = vst.msk [vmem:[#allocation2] sm:$0xff] %vm204_vm0, %v279_v5  ;;  %v1911_v5 = vld [vmem:[%s2270_s1 + $0x1c0] sm:$0xff]  ;;  %2292 = vst [vmem:[#allocation8_spill] sm:$0xff] %v1916_v6 }
  0xef   : > { %2291 = vst [vmem:[#allocation7_spill] sm:$0xff] %v1911_v5 }
  0xf5   : > { %v285_v7 = vld [vmem:[#allocation2] sm:$0xff] }
  0xf6   : > { %v286_v8 = vsel %vm204_vm0, %v285_v7, inf }
  0xf7   : > { %287 = vmin.xlane.f32.xlu0 %v286_v8  ;;  %v1934_v8 = vld [vmem:[%s2270_s1 + $0xd8] sm:$0xff] }
  0xf8   : > { %2294 = vst [vmem:[#allocation10_spill] sm:$0xff] %v1934_v8 }
 0x184   : > { %v288_v9 = vpop.xlane.xlu0 %287 }
 0x185   : > { %v289_v10 = vsub.f32 %v288_v9, %v285_v7  ;;  %v1927_v7 = vld [vmem:[%s2270_s1 + $0x1c8] sm:$0xff]  ;;  %v1939_v9 = vld [vmem:[%s2270_s1 + $0x1d0] sm:$0xff] }
 0x186   : > { %2293 = vst [vmem:[#allocation9_spill] sm:$0xff] %v1927_v7  ;;  %2295 = vst [vmem:[#allocation11_spill] sm:$0xff] %v1939_v9 }
 0x187   : > { %v290_v11 = vmul.f32 1.442695, %v289_v10  ;;  %v1944_v10 = vld [vmem:[%s2270_s1 + $0xe0] sm:$0xff] }
 0x188   : > { %2296 = vst [vmem:[#allocation12_spill] sm:$0xff] %v1944_v10 }
 0x189   : > { %1468 = vpow2.f32 %v290_v11  ;;  %v1955_v11 = vld [vmem:[%s2270_s1 + $0x1d8] sm:$0xff] }
 0x18a   : > { %2297 = vst [vmem:[#allocation13_spill] sm:$0xff] %v1955_v11 }
 0x193   : > { %v1469_v12 = vpop.eup %1468 }
 0x194   : > { %v292_v13 = vsel %vm204_vm0, %v1469_v12, 0.0 }
 0x195   : > { %293 = vadd.xlane.f32.xlu0 %v292_v13  ;;  %v1967_v13 = vld [vmem:[%s2270_s1 + $0x1e0] sm:$0xff] }
 0x196   : > { %2299 = vst [vmem:[#allocation15_spill] sm:$0xff] %v1967_v13 }
 0x222   : > { %v294_v16 = vpop.xlane.xlu0 %293 }
 0x223   : > { %1470 = vrcp.f32 %v294_v16  ;;  %v1978_v16 = vld [vmem:[%s2270_s1 + $0x1e8] sm:$0xff] }
 0x224   : > { %2300 = vst [vmem:[#allocation16_spill] sm:$0xff] %v1978_v16 }
 0x22d   : > { %v1471_v17 = vpop.eup %1470 }
 0x22e   : > { %v296_v18 = vmul.f32 %v1471_v17, %v1469_v12  ;;  %v1962_v12 = vld [vmem:[%s2270_s1 + $0xe8] sm:$0xff]  ;;  %v1983_v17 = vld [vmem:[%s2270_s1 + $0x1f0] sm:$0xff] }
 0x22f   : > { %2298 = vst [vmem:[#allocation14_spill] sm:$0xff] %v1962_v12  ;;  %2301 = vst [vmem:[#allocation17_spill] sm:$0xff] %v1983_v17 }
 0x230   : > { %1343 = vmatprep.subr.mxu0 %v296_v18  ;;  %1441 = vmatprep.subr.mxu1 %v296_v18 }
 0x231   : > { %1344 = vmatpush3.msra.mxu0 %v296_v18  ;;  %1442 = vmatpush3.msra.mxu1 %v296_v18  ;;  %v1992_v18 = vld [vmem:[%s2270_s1 + $0x1f8] sm:$0xff] }
 0x232   : > { %1391 = vmatmul.mubr.msk.f32.vlgmr.msra.gmra.mrb[0].mxu1 %vm204_vm0, %v1565_v19  ;;  %1346 = vmatmul.mubr.msk.f32.vlgmr.msra.gmra.mrb[2].mxu0 %vm204_vm0, %v1570_v20  ;;  %2302 = vst [vmem:[#allocation18_spill] sm:$0xff] %v1992_v18 }
 0x233   : > { %1393 = vmatprep.mubr.msk.f32.mxu1 %vm204_vm0, %v1575_v21  ;;  %1348 = vmatprep.mubr.msk.f32.mxu0 %vm204_vm0, %v1580_v22 }
 0x236   : > { %1394 = vmatmul.mubr.msk.f32.gmra.mrb[2].mxu1 %vm204_vm0, %v1591_v23  ;;  %1349 = vmatmul.mubr.msk.f32.gmra.mrb[4].mxu0 %vm204_vm0, %v1598_v24 }
 0x237   : > { %1396 = vmatprep.mubr.msk.f32.mxu1 %vm204_vm0, %v1603_v25  ;;  %1351 = vmatprep.mubr.msk.f32.mxu0 %vm204_vm0, %v1608_v26 }
 0x23a   : > { %1397 = vmatmul.mubr.msk.f32.gmra.mrb[4].mxu1 %vm204_vm0, %v1619_v27  ;;  %1352 = vmatmul.mubr.msk.f32.gmra.mrb[6].mxu0 %vm204_vm0, %v1626_v28 }
 0x23b   : > { %1399 = vmatprep.mubr.msk.f32.mxu1 %vm204_vm0, %v1631_v29  ;;  %1354 = vmatprep.mubr.msk.f32.mxu0 %vm204_vm0, %v1636_v30 }
 0x23e   : > { %1400 = vmatmul.mubr.msk.f32.gmra.mrb[6].mxu1 %vm204_vm0, %v1647_v31  ;;  %1355 = vmatmul.mubr.msk.f32.gmra.mrb[8].mxu0 %vm204_vm0, %v1654_v32 }
 0x23f   : > { %1402 = vmatprep.mubr.msk.f32.mxu1 %vm204_vm0, %v1659_v33  ;;  %1357 = vmatprep.mubr.msk.f32.mxu0 %vm204_vm0, %v1664_v34 }
 0x242   : > { %1403 = vmatmul.mubr.msk.f32.gmra.mrb[8].mxu1 %vm204_vm0, %v1675_v35  ;;  %1358 = vmatmul.mubr.msk.f32.gmra.mrb[10].mxu0 %vm204_vm0, %v1682_v36 }
 0x243   : > { %1405 = vmatprep.mubr.msk.f32.mxu1 %vm204_vm0, %v1687_v37  ;;  %1360 = vmatprep.mubr.msk.f32.mxu0 %vm204_vm0, %v1692_v38 }
 0x246   : > { %1406 = vmatmul.mubr.msk.f32.gmra.mrb[10].mxu1 %vm204_vm0, %v1703_v39  ;;  %1361 = vmatmul.mubr.msk.f32.gmra.mrb[12].mxu0 %vm204_vm0, %v1710_v40 }
 0x247   : > { %1408 = vmatprep.mubr.msk.f32.mxu1 %vm204_vm0, %v1715_v41  ;;  %1363 = vmatprep.mubr.msk.f32.mxu0 %vm204_vm0, %v1720_v42 }
 0x24a   : > { %1409 = vmatmul.mubr.msk.f32.gmra.mrb[12].mxu1 %vm204_vm0, %v1731_v43  ;;  %1364 = vmatmul.mubr.msk.f32.gmra.mrb[14].mxu0 %vm204_vm0, %v1738_v44 }
 0x24b   : > { %1411 = vmatprep.mubr.msk.f32.mxu1 %vm204_vm0, %v1743_v45  ;;  %1366 = vmatprep.mubr.msk.f32.mxu0 %vm204_vm0, %v1748_v46 }
 0x24e   : > { %1412 = vmatmul.mubr.msk.f32.gmra.mrb[14].mxu1 %vm204_vm0, %v1759_v47  ;;  %1367 = vmatmul.mubr.msk.f32.gmra.mrb[16].mxu0 %vm204_vm0, %v1766_v48 }
 0x24f   : > { %1414 = vmatprep.mubr.msk.f32.mxu1 %vm204_vm0, %v1771_v49  ;;  %1369 = vmatprep.mubr.msk.f32.mxu0 %vm204_vm0, %v1776_v50 }
 0x252   : > { %1415 = vmatmul.mubr.msk.f32.gmra.mrb[16].mxu1 %vm204_vm0, %v1787_v51  ;;  %1370 = vmatmul.mubr.msk.f32.gmra.mrb[18].mxu0 %vm204_vm0, %v1794_v52 }
 0x253   : > { %1417 = vmatprep.mubr.msk.f32.mxu1 %vm204_vm0, %v1799_v53  ;;  %1372 = vmatprep.mubr.msk.f32.mxu0 %vm204_vm0, %v1804_v54 }
 0x256   : > { %1418 = vmatmul.mubr.msk.f32.gmra.mrb[18].mxu1 %vm204_vm0, %v1815_v55  ;;  %1373 = vmatmul.mubr.msk.f32.gmra.mrb[20].mxu0 %vm204_vm0, %v1822_v56 }
 0x257   : > { %1420 = vmatprep.mubr.msk.f32.mxu1 %vm204_vm0, %v1827_v57  ;;  %1375 = vmatprep.mubr.msk.f32.mxu0 %vm204_vm0, %v1832_v58 }
 0x25a   : > { %1421 = vmatmul.mubr.msk.f32.gmra.mrb[20].mxu1 %vm204_vm0, %v1843_v59  ;;  %1376 = vmatmul.mubr.msk.f32.gmra.mrb[22].mxu0 %vm204_vm0, %v1850_v60 }
 0x25b   : > { %1423 = vmatprep.mubr.msk.f32.mxu1 %vm204_vm0, %v1855_v61  ;;  %1378 = vmatprep.mubr.msk.f32.mxu0 %vm204_vm0, %v1860_v62 }
 0x25e   : > { %1424 = vmatmul.mubr.msk.f32.gmra.mrb[22].mxu1 %vm204_vm0, %v1871_v63  ;;  %1379 = vmatmul.mubr.msk.f32.gmra.mrb[24].mxu0 %vm204_vm0, %v1878_v0 }
 0x25f   : > { %1426 = vmatprep.mubr.msk.f32.mxu1 %vm204_vm0, %v1883_v1  ;;  %1381 = vmatprep.mubr.msk.f32.mxu0 %vm204_vm0, %v1888_v2 }
 0x262   : > { %1427 = vmatmul.mubr.msk.f32.gmra.mrb[24].mxu1 %vm204_vm0, %v1899_v3  ;;  %1382 = vmatmul.mubr.msk.f32.gmra.mrb[26].mxu0 %vm204_vm0, %v1906_v4 }
 0x263   : > { %1429 = vmatprep.mubr.msk.f32.mxu1 %vm204_vm0, %v1911_v5  ;;  %1384 = vmatprep.mubr.msk.f32.mxu0 %vm204_vm0, %v1916_v6 }
 0x266   : > { %1430 = vmatmul.mubr.msk.f32.gmra.mrb[26].mxu1 %vm204_vm0, %v1927_v7  ;;  %1385 = vmatmul.mubr.msk.f32.gmra.mrb[28].mxu0 %vm204_vm0, %v1934_v8 }
 0x267   : > { %1432 = vmatprep.mubr.msk.f32.mxu1 %vm204_vm0, %v1939_v9  ;;  %1387 = vmatprep.mubr.msk.f32.mxu0 %vm204_vm0, %v1944_v10 }
 0x26a   : > { %1433 = vmatmul.mubr.msk.f32.gmra.mrb[28].mxu1 %vm204_vm0, %v1955_v11  ;;  %1388 = vmatmul.mubr.msk.f32.gmra.mrb[30].mxu0 %vm204_vm0, %v1962_v12 }
 0x26b   : > { %1435 = vmatprep.mubr.msk.f32.mxu1 %vm204_vm0, %v1967_v13  ;;  %v1996_v13 = vstv %s361_s29 }
 0x26e   : > { %1436 = vmatmul.mubr.msk.f32.gmra.mrb[30].mxu1 %vm204_vm0, %v1978_v16 }
 0x26f   : > { %1438 = vmatprep.mubr.msk.f32.mxu1 %vm204_vm0, %v1983_v17 }
 0x272   : > { %1439 = vmatmul.mubr.msk.f32.gmra.mrb[32].mxu1 %vm204_vm0, %v1992_v18 }
 0x305   : > { %v1392_v10 = vpop.f32.mrb[0].mxu1  ;;  %v1347_v9 = vpop.f32.mrb[2].mxu0 }
 0x306   : > { %v971_v12 = vmul.f32 %v1392_v10, %v1996_v13  ;;  %v770_v16 = vpop.f32.mrb[1].mxu1  ;;  %v941_v11 = vmul.f32 %v1347_v9, %v1996_v13  ;;  %v620_v17 = vpop.f32.mrb[3].mxu0 }
 0x307   : > { %v970_v18 = vmul.f32 %v1996_v13, %v770_v16  ;;  %v940_v6 = vmul.f32 %v1996_v13, %v620_v17 }
 0x308   : > { %v1035_v5 = vadd.f32 %v971_v12, %v1565_v19  ;;  %v1005_v10 = vadd.f32 %v941_v11, %v1570_v20 }
 0x309   : > { %v1034_v9 = vadd.f32 %v970_v18, %v1551_v14  ;;  %v1395_v8 = vpop.f32.mrb[2].mxu1  ;;  %v1004_v7 = vadd.f32 %v940_v6, %v1558_v15  ;;  %v1350_v2 = vpop.f32.mrb[4].mxu0 }
 0x30a   : > { %1099 = vst.msk [vmem:[%s2004_s6 + $0xf8] sm:$0xff] %vm204_vm0, %v1035_v5  ;;  %v973_v1 = vmul.f32 %v1395_v8, %v1996_v13  ;;  %v780_v4 = vpop.f32.mrb[3].mxu1  ;;  %1069 = vst.msk [vmem:[%s2004_s6 + $0x8] sm:$0xff] %vm204_vm0, %v1005_v10  ;;  %v943_v16 = vmul.f32 %v1350_v2, %v1996_v13  ;;  %v630_v19 = vpop.f32.mrb[5].mxu0 }
 0x30b   : > { %1098 = vst.msk [vmem:[%s2004_s6 + $0xf0] sm:$0xff] %vm204_vm0, %v1034_v9  ;;  %v972_v14 = vmul.f32 %v1996_v13, %v780_v4  ;;  %1068 = vst.msk [vmem:[%s2004_s6] sm:$0xff] %vm204_vm0, %v1004_v7  ;;  %v942_v15 = vmul.f32 %v1996_v13, %v630_v19 }
 0x30c   : > { %v1037_v20 = vadd.f32 %v973_v1, %v1591_v23  ;;  %v1007_v5 = vadd.f32 %v943_v16, %v1598_v24 }
 0x30d   : > { %v1036_v6 = vadd.f32 %v972_v14, %v1575_v21  ;;  %v1398_v8 = vpop.f32.mrb[4].mxu1  ;;  %v1006_v2 = vadd.f32 %v942_v15, %v1580_v22  ;;  %v1353_v11 = vpop.f32.mrb[6].mxu0 }
 0x30e   : > { %1101 = vst.msk [vmem:[%s2004_s6 + $0x108] sm:$0xff] %vm204_vm0, %v1037_v20  ;;  %v975_v4 = vmul.f32 %v1398_v8, %v1996_v13  ;;  %v790_v12 = vpop.f32.mrb[5].mxu1  ;;  %1071 = vst.msk [vmem:[%s2004_s6 + $0x18] sm:$0xff] %vm204_vm0, %v1007_v5  ;;  %v945_v7 = vmul.f32 %v1353_v11, %v1996_v13  ;;  %v640_v23 = vpop.f32.mrb[7].mxu0 }
 0x30f   : > { %1100 = vst.msk [vmem:[%s2004_s6 + $0x100] sm:$0xff] %vm204_vm0, %v1036_v6  ;;  %v974_v21 = vmul.f32 %v1996_v13, %v790_v12  ;;  %1070 = vst.msk [vmem:[%s2004_s6 + $0x10] sm:$0xff] %vm204_vm0, %v1006_v2  ;;  %v944_v22 = vmul.f32 %v1996_v13, %v640_v23 }
 0x310   : > { %v1039_v24 = vadd.f32 %v975_v4, %v1619_v27  ;;  %v1009_v1 = vadd.f32 %v945_v7, %v1626_v28 }
 0x311   : > { %v1038_v17 = vadd.f32 %v974_v21, %v1603_v25  ;;  %v1401_v18 = vpop.f32.mrb[6].mxu1  ;;  %v1008_v10 = vadd.f32 %v944_v22, %v1608_v26  ;;  %v1356_v9 = vpop.f32.mrb[8].mxu0 }
 0x312   : > { %1103 = vst.msk [vmem:[%s2004_s6 + $0x118] sm:$0xff] %vm204_vm0, %v1039_v24  ;;  %v977_v16 = vmul.f32 %v1401_v18, %v1996_v13  ;;  %v800_v19 = vpop.f32.mrb[7].mxu1  ;;  %1073 = vst.msk [vmem:[%s2004_s6 + $0x28] sm:$0xff] %vm204_vm0, %v1009_v1  ;;  %v947_v14 = vmul.f32 %v1356_v9, %v1996_v13  ;;  %v650_v27 = vpop.f32.mrb[9].mxu0 }
 0x313   : > { %1102 = vst.msk [vmem:[%s2004_s6 + $0x110] sm:$0xff] %vm204_vm0, %v1038_v17  ;;  %v976_v25 = vmul.f32 %v1996_v13, %v800_v19  ;;  %1072 = vst.msk [vmem:[%s2004_s6 + $0x20] sm:$0xff] %vm204_vm0, %v1008_v10  ;;  %v946_v26 = vmul.f32 %v1996_v13, %v650_v27 }
 0x314   : > { %v1041_v28 = vadd.f32 %v977_v16, %v1647_v31  ;;  %v1011_v15 = vadd.f32 %v947_v14, %v1654_v32 }
 0x315   : > { %v1040_v20 = vadd.f32 %v976_v25, %v1631_v29  ;;  %v1404_v5 = vpop.f32.mrb[8].mxu1  ;;  %v1010_v6 = vadd.f32 %v946_v26, %v1636_v30  ;;  %v1359_v8 = vpop.f32.mrb[10].mxu0 }
 0x316   : > { %1105 = vst.msk [vmem:[%s2004_s6 + $0x128] sm:$0xff] %vm204_vm0, %v1041_v28  ;;  %v979_v2 = vmul.f32 %v1404_v5, %v1996_v13  ;;  %v810_v11 = vpop.f32.mrb[9].mxu1  ;;  %1075 = vst.msk [vmem:[%s2004_s6 + $0x38] sm:$0xff] %vm204_vm0, %v1011_v15  ;;  %v949_v4 = vmul.f32 %v1359_v8, %v1996_v13  ;;  %v660_v31 = vpop.f32.mrb[11].mxu0 }
 0x317   : > { %1104 = vst.msk [vmem:[%s2004_s6 + $0x120] sm:$0xff] %vm204_vm0, %v1040_v20  ;;  %v978_v29 = vmul.f32 %v1996_v13, %v810_v11  ;;  %1074 = vst.msk [vmem:[%s2004_s6 + $0x30] sm:$0xff] %vm204_vm0, %v1010_v6  ;;  %v948_v30 = vmul.f32 %v1996_v13, %v660_v31 }
 0x318   : > { %v1043_v32 = vadd.f32 %v979_v2, %v1675_v35  ;;  %v1013_v12 = vadd.f32 %v949_v4, %v1682_v36 }
 0x319   : > { %v1042_v7 = vadd.f32 %v978_v29, %v1659_v33  ;;  %v1407_v23 = vpop.f32.mrb[10].mxu1  ;;  %v1012_v21 = vadd.f32 %v948_v30, %v1664_v34  ;;  %v1362_v22 = vpop.f32.mrb[12].mxu0 }
 0x31a   : > { %1107 = vst.msk [vmem:[%s2004_s6 + $0x138] sm:$0xff] %vm204_vm0, %v1043_v32  ;;  %v981_v24 = vmul.f32 %v1407_v23, %v1996_v13  ;;  %v820_v1 = vpop.f32.mrb[11].mxu1  ;;  %1077 = vst.msk [vmem:[%s2004_s6 + $0x48] sm:$0xff] %vm204_vm0, %v1013_v12  ;;  %v951_v17 = vmul.f32 %v1362_v22, %v1996_v13  ;;  %v670_v35 = vpop.f32.mrb[13].mxu0 }
 0x31b   : > { %1106 = vst.msk [vmem:[%s2004_s6 + $0x130] sm:$0xff] %vm204_vm0, %v1042_v7  ;;  %v980_v33 = vmul.f32 %v1996_v13, %v820_v1  ;;  %1076 = vst.msk [vmem:[%s2004_s6 + $0x40] sm:$0xff] %vm204_vm0, %v1012_v21  ;;  %v950_v34 = vmul.f32 %v1996_v13, %v670_v35 }
 0x31c   : > { %v1045_v36 = vadd.f32 %v981_v24, %v1703_v39  ;;  %v1015_v18 = vadd.f32 %v951_v17, %v1710_v40 }
 0x31d   : > { %v1044_v10 = vadd.f32 %v980_v33, %v1687_v37  ;;  %v1410_v9 = vpop.f32.mrb[12].mxu1  ;;  %v1014_v16 = vadd.f32 %v950_v34, %v1692_v38  ;;  %v1365_v19 = vpop.f32.mrb[14].mxu0 }
 0x31e   : > { %1109 = vst.msk [vmem:[%s2004_s6 + $0x148] sm:$0xff] %vm204_vm0, %v1045_v36  ;;  %v983_v14 = vmul.f32 %v1410_v9, %v1996_v13  ;;  %v830_v27 = vpop.f32.mrb[13].mxu1  ;;  %1079 = vst.msk [vmem:[%s2004_s6 + $0x58] sm:$0xff] %vm204_vm0, %v1015_v18  ;;  %v953_v25 = vmul.f32 %v1365_v19, %v1996_v13  ;;  %v680_v39 = vpop.f32.mrb[15].mxu0 }
 0x31f   : > { %1108 = vst.msk [vmem:[%s2004_s6 + $0x140] sm:$0xff] %vm204_vm0, %v1044_v10  ;;  %v982_v37 = vmul.f32 %v1996_v13, %v830_v27  ;;  %1078 = vst.msk [vmem:[%s2004_s6 + $0x50] sm:$0xff] %vm204_vm0, %v1014_v16  ;;  %v952_v38 = vmul.f32 %v1996_v13, %v680_v39 }
 0x320   : > { %v1047_v40 = vadd.f32 %v983_v14, %v1731_v43  ;;  %v1017_v26 = vadd.f32 %v953_v25, %v1738_v44 }
 0x321   : > { %v1046_v28 = vadd.f32 %v982_v37, %v1715_v41  ;;  %v1413_v15 = vpop.f32.mrb[14].mxu1  ;;  %v1016_v20 = vadd.f32 %v952_v38, %v1720_v42  ;;  %v1368_v5 = vpop.f32.mrb[16].mxu0 }
 0x322   : > { %1111 = vst.msk [vmem:[%s2004_s6 + $0x158] sm:$0xff] %vm204_vm0, %v1047_v40  ;;  %v985_v6 = vmul.f32 %v1413_v15, %v1996_v13  ;;  %v840_v8 = vpop.f32.mrb[15].mxu1  ;;  %1081 = vst.msk [vmem:[%s2004_s6 + $0x68] sm:$0xff] %vm204_vm0, %v1017_v26  ;;  %v955_v2 = vmul.f32 %v1368_v5, %v1996_v13  ;;  %v690_v43 = vpop.f32.mrb[17].mxu0 }
 0x323   : > { %1110 = vst.msk [vmem:[%s2004_s6 + $0x150] sm:$0xff] %vm204_vm0, %v1046_v28  ;;  %v984_v41 = vmul.f32 %v1996_v13, %v840_v8  ;;  %1080 = vst.msk [vmem:[%s2004_s6 + $0x60] sm:$0xff] %vm204_vm0, %v1016_v20  ;;  %v954_v42 = vmul.f32 %v1996_v13, %v690_v43 }
 0x324   : > { %v1049_v44 = vadd.f32 %v985_v6, %v1759_v47  ;;  %v1019_v11 = vadd.f32 %v955_v2, %v1766_v48 }
 0x325   : > { %v1048_v4 = vadd.f32 %v984_v41, %v1743_v45  ;;  %v1416_v31 = vpop.f32.mrb[16].mxu1  ;;  %v1018_v29 = vadd.f32 %v954_v42, %v1748_v46  ;;  %v1371_v30 = vpop.f32.mrb[18].mxu0  ;;  %v2303_v42 = vld [vmem:[#allocation6_spill] sm:$0xff] }
 0x326   : > { %1113 = vst.msk [vmem:[%s2004_s6 + $0x168] sm:$0xff] %vm204_vm0, %v1049_v44  ;;  %v987_v32 = vmul.f32 %v1416_v31, %v1996_v13  ;;  %v850_v12 = vpop.f32.mrb[17].mxu1  ;;  %1083 = vst.msk [vmem:[%s2004_s6 + $0x78] sm:$0xff] %vm204_vm0, %v1019_v11  ;;  %v957_v7 = vmul.f32 %v1371_v30, %v1996_v13  ;;  %v700_v47 = vpop.f32.mrb[19].mxu0  ;;  %v2304_v11 = vld [vmem:[#allocation4_spill] sm:$0xff] }
 0x327   : > { %1112 = vst.msk [vmem:[%s2004_s6 + $0x160] sm:$0xff] %vm204_vm0, %v1048_v4  ;;  %v986_v45 = vmul.f32 %v1996_v13, %v850_v12  ;;  %1082 = vst.msk [vmem:[%s2004_s6 + $0x70] sm:$0xff] %vm204_vm0, %v1018_v29  ;;  %v956_v46 = vmul.f32 %v1996_v13, %v700_v47  ;;  %v2305_v29 = vld [vmem:[#allocation5_spill] sm:$0xff] }
 0x328   : > { %v1051_v48 = vadd.f32 %v987_v32, %v1787_v51  ;;  %v1021_v23 = vadd.f32 %v957_v7, %v1794_v52 }
 0x329   : > { %v1050_v21 = vadd.f32 %v986_v45, %v1771_v49  ;;  %v1419_v22 = vpop.f32.mrb[18].mxu1  ;;  %v1020_v24 = vadd.f32 %v956_v46, %v1776_v50  ;;  %v1374_v1 = vpop.f32.mrb[20].mxu0 }
 0x32a   : > { %1115 = vst.msk [vmem:[%s2004_s6 + $0x178] sm:$0xff] %vm204_vm0, %v1051_v48  ;;  %v989_v17 = vmul.f32 %v1419_v22, %v1996_v13  ;;  %v860_v35 = vpop.f32.mrb[19].mxu1  ;;  %1085 = vst.msk [vmem:[%s2004_s6 + $0x88] sm:$0xff] %vm204_vm0, %v1021_v23  ;;  %v959_v33 = vmul.f32 %v1374_v1, %v1996_v13  ;;  %v710_v51 = vpop.f32.mrb[21].mxu0  ;;  %v2306_v48 = vld [vmem:[#allocation9_spill] sm:$0xff] }
 0x32b   : > { %1114 = vst.msk [vmem:[%s2004_s6 + $0x170] sm:$0xff] %vm204_vm0, %v1050_v21  ;;  %v988_v49 = vmul.f32 %v1996_v13, %v860_v35  ;;  %1084 = vst.msk [vmem:[%s2004_s6 + $0x80] sm:$0xff] %vm204_vm0, %v1020_v24  ;;  %v958_v50 = vmul.f32 %v1996_v13, %v710_v51  ;;  %v2307_v21 = vld [vmem:[#allocation10_spill] sm:$0xff]  ;;  %v2308_v24 = vld [vmem:[#allocation7_spill] sm:$0xff] }
 0x32c   : > { %v1053_v52 = vadd.f32 %v989_v17, %v1815_v55  ;;  %v1023_v34 = vadd.f32 %v959_v33, %v1822_v56  ;;  %v2309_v35 = vld [vmem:[#allocation8_spill] sm:$0xff] }
 0x32d   : > { %v1052_v36 = vadd.f32 %v988_v49, %v1799_v53  ;;  %v1422_v18 = vpop.f32.mrb[20].mxu1  ;;  %v1022_v10 = vadd.f32 %v958_v50, %v1804_v54  ;;  %v1377_v9 = vpop.f32.mrb[22].mxu0 }
 0x32e   : > { %1117 = vst.msk [vmem:[%s2004_s6 + $0x188] sm:$0xff] %vm204_vm0, %v1053_v52  ;;  %v991_v16 = vmul.f32 %v1422_v18, %v1996_v13  ;;  %v870_v19 = vpop.f32.mrb[21].mxu1  ;;  %1087 = vst.msk [vmem:[%s2004_s6 + $0x98] sm:$0xff] %vm204_vm0, %v1023_v34  ;;  %v961_v14 = vmul.f32 %v1377_v9, %v1996_v13  ;;  %v720_v55 = vpop.f32.mrb[23].mxu0 }
 0x32f   : > { %1116 = vst.msk [vmem:[%s2004_s6 + $0x180] sm:$0xff] %vm204_vm0, %v1052_v36  ;;  %v990_v53 = vmul.f32 %v1996_v13, %v870_v19  ;;  %1086 = vst.msk [vmem:[%s2004_s6 + $0x90] sm:$0xff] %vm204_vm0, %v1022_v10  ;;  %v960_v54 = vmul.f32 %v1996_v13, %v720_v55  ;;  %v2310_v10 = vld [vmem:[#allocation13_spill] sm:$0xff] }
 0x330   : > { %v1055_v56 = vadd.f32 %v991_v16, %v1843_v59  ;;  %v1025_v27 = vadd.f32 %v961_v14, %v1850_v60  ;;  %v2311_v16 = vld [vmem:[#allocation14_spill] sm:$0xff]  ;;  %v2312_v14 = vld [vmem:[#allocation11_spill] sm:$0xff] }
 0x331   : > { %v1054_v25 = vadd.f32 %v990_v53, %v1827_v57  ;;  %v1425_v39 = vpop.f32.mrb[22].mxu1  ;;  %v1024_v37 = vadd.f32 %v960_v54, %v1832_v58  ;;  %v1380_v38 = vpop.f32.mrb[24].mxu0  ;;  %v2313_v54 = vld [vmem:[#allocation12_spill] sm:$0xff] }
 0x332   : > { %1119 = vst.msk [vmem:[%s2004_s6 + $0x198] sm:$0xff] %vm204_vm0, %v1055_v56  ;;  %v993_v40 = vmul.f32 %v1425_v39, %v1996_v13  ;;  %v880_v26 = vpop.f32.mrb[23].mxu1  ;;  %1089 = vst.msk [vmem:[%s2004_s6 + $0xa8] sm:$0xff] %vm204_vm0, %v1025_v27  ;;  %v963_v28 = vmul.f32 %v1380_v38, %v1996_v13  ;;  %v730_v59 = vpop.f32.mrb[25].mxu0 }
 0x333   : > { %1118 = vst.msk [vmem:[%s2004_s6 + $0x190] sm:$0xff] %vm204_vm0, %v1054_v25  ;;  %v992_v57 = vmul.f32 %v1996_v13, %v880_v26  ;;  %1088 = vst.msk [vmem:[%s2004_s6 + $0xa0] sm:$0xff] %vm204_vm0, %v1024_v37  ;;  %v962_v58 = vmul.f32 %v1996_v13, %v730_v59  ;;  %v2314_v37 = vld [vmem:[#allocation16_spill] sm:$0xff] }
 0x334   : > { %v1057_v60 = vadd.f32 %v993_v40, %v1871_v63  ;;  %v1027_v15 = vadd.f32 %v963_v28, %v1878_v0  ;;  %v2315_v40 = vld [vmem:[#allocation15_spill] sm:$0xff] }
 0x335   : > { %v1056_v20 = vadd.f32 %v992_v57, %v1855_v61  ;;  %v1428_v5 = vpop.f32.mrb[24].mxu1  ;;  %v1026_v6 = vadd.f32 %v962_v58, %v1860_v62  ;;  %v1383_v8 = vpop.f32.mrb[26].mxu0 }
 0x336   : > { %1121 = vst.msk [vmem:[%s2004_s6 + $0x1a8] sm:$0xff] %vm204_vm0, %v1057_v60  ;;  %v995_v2 = vmul.f32 %v1428_v5, %v1996_v13  ;;  %v890_v43 = vpop.f32.mrb[25].mxu1  ;;  %1091 = vst.msk [vmem:[%s2004_s6 + $0xb8] sm:$0xff] %vm204_vm0, %v1027_v15  ;;  %v965_v41 = vmul.f32 %v1383_v8, %v1996_v13  ;;  %v740_v63 = vpop.f32.mrb[27].mxu0  ;;  %v2316_v60 = vld [vmem:[#allocation18_spill] sm:$0xff] }
 0x337   : > { %1120 = vst.msk [vmem:[%s2004_s6 + $0x1a0] sm:$0xff] %vm204_vm0, %v1056_v20  ;;  %v994_v61 = vmul.f32 %v1996_v13, %v890_v43  ;;  %1090 = vst.msk [vmem:[%s2004_s6 + $0xb0] sm:$0xff] %vm204_vm0, %v1026_v6  ;;  %v964_v62 = vmul.f32 %v1996_v13, %v740_v63  ;;  %v2317_v20 = vld [vmem:[#allocation17_spill] sm:$0xff] }
 0x338   : > { %v1059_v0 = vadd.f32 %v995_v2, %v1899_v3  ;;  %v1029_v44 = vadd.f32 %v965_v41, %v2303_v42 }
 0x339   : > { %v1058_v4 = vadd.f32 %v994_v61, %v2304_v11  ;;  %v1431_v31 = vpop.f32.mrb[26].mxu1  ;;  %v1028_v30 = vadd.f32 %v964_v62, %v2305_v29  ;;  %v1386_v32 = vpop.f32.mrb[28].mxu0 }
 0x33a   : > { %1123 = vst.msk [vmem:[%s2004_s6 + $0x1b8] sm:$0xff] %vm204_vm0, %v1059_v0  ;;  %v997_v12 = vmul.f32 %v1431_v31, %v1996_v13  ;;  %v900_v7 = vpop.f32.mrb[27].mxu1  ;;  %1093 = vst.msk [vmem:[%s2004_s6 + $0xc8] sm:$0xff] %vm204_vm0, %v1029_v44  ;;  %v967_v47 = vmul.f32 %v1386_v32, %v1996_v13  ;;  %v750_v3 = vpop.f32.mrb[29].mxu0 }
 0x33b   : > { %1122 = vst.msk [vmem:[%s2004_s6 + $0x1b0] sm:$0xff] %vm204_vm0, %v1058_v4  ;;  %v996_v45 = vmul.f32 %v1996_v13, %v900_v7  ;;  %1092 = vst.msk [vmem:[%s2004_s6 + $0xc0] sm:$0xff] %vm204_vm0, %v1028_v30  ;;  %v966_v46 = vmul.f32 %v1996_v13, %v750_v3 }
 0x33c   : > { %v1061_v23 = vadd.f32 %v997_v12, %v2306_v48  ;;  %v1031_v22 = vadd.f32 %v967_v47, %v2307_v21 }
 0x33d   : > { %v1060_v1 = vadd.f32 %v996_v45, %v2308_v24  ;;  %v1434_v17 = vpop.f32.mrb[28].mxu1  ;;  %v1030_v33 = vadd.f32 %v966_v46, %v2309_v35  ;;  %v1389_v51 = vpop.f32.mrb[30].mxu0 }
 0x33e   : > { %1125 = vst.msk [vmem:[%s2004_s6 + $0x1c8] sm:$0xff] %vm204_vm0, %v1061_v23  ;;  %v999_v49 = vmul.f32 %v1434_v17, %v1996_v13  ;;  %v910_v50 = vpop.f32.mrb[29].mxu1  ;;  %1095 = vst.msk [vmem:[%s2004_s6 + $0xd8] sm:$0xff] %vm204_vm0, %v1031_v22  ;;  %v969_v52 = vmul.f32 %v1389_v51, %v1996_v13  ;;  %v760_v34 = vpop.f32.mrb[31].mxu0 }
 0x33f   : > { %1124 = vst.msk [vmem:[%s2004_s6 + $0x1c0] sm:$0xff] %vm204_vm0, %v1060_v1  ;;  %v998_v36 = vmul.f32 %v1996_v13, %v910_v50  ;;  %1094 = vst.msk [vmem:[%s2004_s6 + $0xd0] sm:$0xff] %vm204_vm0, %v1030_v33  ;;  %v968_v18 = vmul.f32 %v1996_v13, %v760_v34 }
 0x340   : > { %v1063_v9 = vadd.f32 %v999_v49, %v2310_v10  ;;  %v1033_v19 = vadd.f32 %v969_v52, %v2311_v16 }
 0x341   : > { %v1062_v55 = vadd.f32 %v998_v36, %v2312_v14  ;;  %v1437_v53 = vpop.f32.mrb[30].mxu1  ;;  %v1032_v56 = vadd.f32 %v968_v18, %v2313_v54 }
 0x342   : > { %1127 = vst.msk [vmem:[%s2004_s6 + $0x1d8] sm:$0xff] %vm204_vm0, %v1063_v9  ;;  %v1001_v27 = vmul.f32 %v1437_v53, %v1996_v13  ;;  %v920_v25 = vpop.f32.mrb[31].mxu1  ;;  %1097 = vst.msk [vmem:[%s2004_s6 + $0xe8] sm:$0xff] %vm204_vm0, %v1033_v19 }
 0x343   : > { %1126 = vst.msk [vmem:[%s2004_s6 + $0x1d0] sm:$0xff] %vm204_vm0, %v1062_v55  ;;  %v1000_v39 = vmul.f32 %v1996_v13, %v920_v25  ;;  %1096 = vst.msk [vmem:[%s2004_s6 + $0xe0] sm:$0xff] %vm204_vm0, %v1032_v56 }
 0x344   : > { %v1065_v38 = vadd.f32 %v1001_v27, %v2314_v37 }
 0x345   : > { %v1064_v26 = vadd.f32 %v1000_v39, %v2315_v40  ;;  %v1440_v28 = vpop.f32.mrb[32].mxu1 }
 0x346   : > { %1129 = vst.msk [vmem:[%s2004_s6 + $0x1e8] sm:$0xff] %vm204_vm0, %v1065_v38  ;;  %v1003_v59 = vmul.f32 %v1440_v28, %v1996_v13  ;;  %v930_v57 = vpop.f32.mrb[33].mxu1 }
 0x347   : > { %1128 = vst.msk [vmem:[%s2004_s6 + $0x1e0] sm:$0xff] %vm204_vm0, %v1064_v26  ;;  %v1002_v58 = vmul.f32 %v1996_v13, %v930_v57 }
 0x348   : > { %v1067_v15 = vadd.f32 %v1003_v59, %v2316_v60 }
 0x349   : > { %v1066_v5 = vadd.f32 %v1002_v58, %v2317_v20 }
 0x34a   : > { %1131 = vst.msk [vmem:[%s2004_s6 + $0x1f8] sm:$0xff] %vm204_vm0, %v1067_v15 }
 0x34b   : > { %1130 = vst.msk [vmem:[%s2004_s6 + $0x1f0] sm:$0xff] %vm204_vm0, %v1066_v5 }
 0x34c PF: > { %s14_s16 = sadd.s32 1, %s1494_s16   ;;  %s2318_s14 = smov %s1490_s15 }
 0x34d   : > { %p11_p5 = scmp.ge.s32.totalorder %s14_s16, 4   ;;  %s2319_s15 = smov %s2321_s2 }
 0x34f   :  { %13 = sbr.rel (!%p11_p5) target bundleno = 2 (0x2), region = 70 }

</bundles_post_ra>
